<compile_context>
chip_gen: v6e
topology: v6e:2x2x1
jax: 0.10.0
libtpu: 0.0.40
codegen_flags: <defaults>
</compile_context>

<pallas_src>
import functools

import jax
import jax.numpy as jnp
from jax.experimental import pallas as pl
from jax.experimental.pallas import tpu as pltpu

_EPS = 1e-5


def _round_up(v, m):
    return -(-v // m) * m


def _sublane(dtype):
    # fp32 -> 8, bf16 -> 16, int8/fp8 -> 32
    return max(8, 32 // jnp.dtype(dtype).itemsize)


@functools.lru_cache(maxsize=None)
def _budgets():
    """Generation-aware VMEM budgets (v5e/v6e: 128 MiB VMEM, v7x: 64 MiB)."""
    vmem_cap = 64 * 1024 * 1024          # conservative default if query fails
    try:
        info = pltpu.get_tpu_info()
        for name in ("vmem_capacity_bytes", "vmem_size_bytes", "vmem_bytes"):
            v = getattr(info, name, None)
            if v:
                vmem_cap = int(v)
                break
    except Exception:
        pass
    if vmem_cap >= 100 * 1024 * 1024:    # v5e / v6e
        return {"vmem_limit": 96 * 1024 * 1024,
                "tile_target": 6 * 1024 * 1024,
                "fused_max": 24 * 1024 * 1024}
    else:                                # v7x (or unknown)
        return {"vmem_limit": 48 * 1024 * 1024,
                "tile_target": 4 * 1024 * 1024,
                "fused_max": 12 * 1024 * 1024}


def _padded_f32_bytes_2d(m, c):
    return _round_up(m, 8) * _round_up(c, 128) * 4


def _padded_f32_bytes_3d(n, c, l):
    return n * _round_up(c, 8) * _round_up(l, 128) * 4


# ---------------------------------------------------------------------------
# Fused single-block fast path (small / medium inputs: 2 HBM passes total).
# ---------------------------------------------------------------------------
def _fused2d_kernel(x_ref, gamma_ref, beta_ref, o_ref):
    x = x_ref[...].astype(jnp.float32)               # (M, C)
    m = x.shape[0]
    mean = jnp.sum(x, axis=0, keepdims=True) / m
    cen = x - mean
    var = jnp.sum(cen * cen, axis=0, keepdims=True) / m
    inv = jax.lax.rsqrt(var + _EPS)
    o_ref[...] = (cen * inv * gamma_ref[...] + beta_ref[...]).astype(o_ref.dtype)


def _fused3d_kernel(x_ref, gamma_ref, beta_ref, o_ref):
    x = x_ref[...].astype(jnp.float32)               # (N, C, L)
    cnt = x.shape[0] * x.shape[2]
    mean = jnp.sum(jnp.sum(x, axis=2, keepdims=True), axis=0, keepdims=True) / cnt
    cen = x - mean
    var = jnp.sum(jnp.sum(cen * cen, axis=2, keepdims=True), axis=0, keepdims=True) / cnt
    inv = jax.lax.rsqrt(var + _EPS)
    o_ref[...] = (cen * inv * gamma_ref[...] + beta_ref[...]).astype(o_ref.dtype)


def _bn_2d_fused(x2d, gamma, beta, bud):
    M, C = x2d.shape
    g = gamma.reshape(1, C).astype(jnp.float32)
    b = beta.reshape(1, C).astype(jnp.float32)
    return pl.pallas_call(
        _fused2d_kernel,
        out_shape=jax.ShapeDtypeStruct((M, C), x2d.dtype),
        in_specs=[pl.BlockSpec((M, C), lambda: (0, 0)),
                  pl.BlockSpec((1, C), lambda: (0, 0)),
                  pl.BlockSpec((1, C), lambda: (0, 0))],
        out_specs=pl.BlockSpec((M, C), lambda: (0, 0)),
        compiler_params=pltpu.CompilerParams(vmem_limit_bytes=bud["vmem_limit"]),
    )(x2d, g, b)


def _bn_3d_fused(x, gamma, beta, bud):
    N, C, L = x.shape
    g = gamma.reshape(1, C, 1).astype(jnp.float32)
    b = beta.reshape(1, C, 1).astype(jnp.float32)
    return pl.pallas_call(
        _fused3d_kernel,
        out_shape=jax.ShapeDtypeStruct((N, C, L), x.dtype),
        in_specs=[pl.BlockSpec((N, C, L), lambda: (0, 0, 0)),
                  pl.BlockSpec((1, C, 1), lambda: (0, 0, 0)),
                  pl.BlockSpec((1, C, 1), lambda: (0, 0, 0))],
        out_specs=pl.BlockSpec((N, C, L), lambda: (0, 0, 0)),
        compiler_params=pltpu.CompilerParams(vmem_limit_bytes=bud["vmem_limit"]),
    )(x, g, b)


# ---------------------------------------------------------------------------
# Tiled two-pass path: 2-D input (M, C), re-viewed lane-dense as (M/R, R*C).
# ---------------------------------------------------------------------------
def _choose_repack(M, C):
    """Pick R dividing M so the free row-major view (M//R, R*C) is lane-dense."""
    if C >= 128 or M <= 1:
        return 1

    def util(w):
        return w / float(_round_up(w, 128))

    best_r, best = 1, (util(C), min(C, 1024))
    max_width = 2048
    for r in range(2, min(M, max_width // C) + 1):
        if M % r:
            continue
        w = r * C
        cand = (util(w), min(w, 1024))
        if cand > best:
            best, best_r = cand, r
    return best_r


def _auto_tile_m(Mv, Cv, dtype, target):
    it = jnp.dtype(dtype).itemsize
    sub = _sublane(dtype)
    c_pad = _round_up(Cv, 128)
    rows = (target // (it * c_pad)) // sub * sub
    rows = max(sub, rows)
    return int(min(Mv, rows))


def _make_stats2d_kernel(Mv, tile_m, tps, need_mask):
    def kernel(x_ref, sum_ref, sumsq_ref):
        i = pl.program_id(1)

        @pl.when(i == 0)
        def _init():
            sum_ref[...] = jnp.zeros_like(sum_ref)
            sumsq_ref[...] = jnp.zeros_like(sumsq_ref)

        def accum(x):
            sum_ref[...] += jnp.sum(x, axis=0)[None, None, :]
            sumsq_ref[...] += jnp.sum(x * x, axis=0)[None, None, :]

        if need_mask:
            row0 = (pl.program_id(0) * tps + i) * tile_m   # unclamped global row
            edge = row0 + tile_m > Mv

            @pl.when(edge)
            def _masked():
                x = x_ref[...].astype(jnp.float32)
                rows = jax.lax.broadcasted_iota(jnp.int32, x.shape, 0) + row0
                accum(jnp.where(rows < Mv, x, 0.0))

            @pl.when(jnp.logical_not(edge))
            def _plain():
                accum(x_ref[...].astype(jnp.float32))
        else:
            accum(x_ref[...].astype(jnp.float32))

    return kernel


def _norm2d_kernel(x_ref, scale_ref, bias_ref, o_ref):
    x = x_ref[...].astype(jnp.float32)
    o_ref[...] = (x * scale_ref[...] + bias_ref[...]).astype(o_ref.dtype)


def _bn_2d_two_pass(x2d, gamma, beta, tile_m=None, repack=None):
    M, C = x2d.shape
    bud = _budgets()

    R = _choose_repack(M, C) if repack is None else repack
    Mv, Cv = M // R, R * C
    xv = x2d.reshape(Mv, Cv)                 # free row-major view (lane-dense)

    if tile_m is None:
        tile_m = _auto_tile_m(Mv, Cv, x2d.dtype, bud["tile_target"])
    tile_m = int(min(tile_m, Mv))

    n_tiles = pl.cdiv(Mv, tile_m)
    n_shards = 2 if n_tiles >= 2 else 1      # split stats read across v7x TCs
    tps = pl.cdiv(n_tiles, n_shards)
    need_mask = (Mv % tile_m != 0) or (n_tiles != n_shards * tps)

    # Pass 1: per-shard, per-channel sum / sum-of-squares (fp32 accumulators).
    s_part, q_part = pl.pallas_call(
        _make_stats2d_kernel(Mv, tile_m, tps, need_mask),
        out_shape=(jax.ShapeDtypeStruct((n_shards, 1, Cv), jnp.float32),
                   jax.ShapeDtypeStruct((n_shards, 1, Cv), jnp.float32)),
        grid=(n_shards, tps),
        in_specs=[pl.BlockSpec(
            (tile_m, Cv),
            lambda s, i: (jnp.minimum(s * tps + i, n_tiles - 1), 0))],
        out_specs=(pl.BlockSpec((1, 1, Cv), lambda s, i: (s, 0, 0)),
                   pl.BlockSpec((1, 1, Cv), lambda s, i: (s, 0, 0))),
        compiler_params=pltpu.CompilerParams(
            dimension_semantics=("parallel", "arbitrary"),
            vmem_limit_bytes=bud["vmem_limit"]),
    )(xv)

    # Tiny (C,)-sized math outside the kernel; fold into scale/bias.
    count = jnp.float32(M)
    ssum = s_part.reshape(n_shards, R, C).sum(axis=(0, 1))
    qsum = q_part.reshape(n_shards, R, C).sum(axis=(0, 1))
    mean = ssum / count
    var = jnp.maximum(qsum / count - mean * mean, 0.0)
    inv_std = jax.lax.rsqrt(var + _EPS)
    scale_c = gamma.astype(jnp.float32) * inv_std
    bias_c = beta.astype(jnp.float32) - mean * scale_c
    scale_v = jnp.tile(scale_c.reshape(1, C), (1, R))      # (1, R*C)
    bias_v = jnp.tile(bias_c.reshape(1, C), (1, R))

    # Pass 2: elementwise normalize on the lane-dense view.
    out = pl.pallas_call(
        _norm2d_kernel,
        out_shape=jax.ShapeDtypeStruct((Mv, Cv), x2d.dtype),
        grid=(n_tiles,),
        in_specs=[pl.BlockSpec((tile_m, Cv), lambda i: (i, 0)),
                  pl.BlockSpec((1, Cv), lambda i: (0, 0)),
                  pl.BlockSpec((1, Cv), lambda i: (0, 0))],
        out_specs=pl.BlockSpec((tile_m, Cv), lambda i: (i, 0)),
        compiler_params=pltpu.CompilerParams(
            dimension_semantics=("parallel",),
            vmem_limit_bytes=bud["vmem_limit"]),
    )(xv, scale_v, bias_v)
    return out.reshape(M, C)


# ---------------------------------------------------------------------------
# Tiled two-pass path: 3-D input (N, C, L) in native layout (L on lanes).
# ---------------------------------------------------------------------------
def _auto_tile_l(L):
    cap = 4096                                # multiple of 128 when < L
    return L if L <= cap else cap


def _auto_tile_n(N, C, tile_l, dtype, target):
    it = jnp.dtype(dtype).itemsize
    per_row = it * _round_up(C, _sublane(dtype)) * _round_up(tile_l, 128)
    return int(min(N, max(1, target // per_row)))


def _make_stats3d_kernel(N, L, tile_n, tile_l, n_j, tps, need_mask):
    def kernel(x_ref, sum_ref, sumsq_ref):
        k = pl.program_id(1)

        @pl.when(k == 0)
        def _init():
            sum_ref[...] = jnp.zeros_like(sum_ref)
            sumsq_ref[...] = jnp.zeros_like(sumsq_ref)

        def accum(x):
            s1 = jnp.sum(x, axis=2, keepdims=True)        # lanes first (XLU)
            q1 = jnp.sum(x * x, axis=2, keepdims=True)
            sum_ref[...] += jnp.sum(s1, axis=0, keepdims=True)
            sumsq_ref[...] += jnp.sum(q1, axis=0, keepdims=True)

        if need_mask:
            t = pl.program_id(0) * tps + k                # unclamped linear tile
            n0 = (t // n_j) * tile_n
            l0 = (t % n_j) * tile_l
            edge = jnp.logical_or(n0 + tile_n > N, l0 + tile_l > L)

            @pl.when(edge)
            def _masked():
                x = x_ref[...].astype(jnp.float32)        # (tile_n, C, tile_l)
                rown = jax.lax.broadcasted_iota(jnp.int32, x.shape, 0) + n0
                lane = jax.lax.broadcasted_iota(jnp.int32, x.shape, 2) + l0
                accum(jnp.where(jnp.logical_and(rown < N, lane < L), x, 0.0))

            @pl.when(jnp.logical_not(edge))
            def _plain():
                accum(x_ref[...].astype(jnp.float32))
        else:
            accum(x_ref[...].astype(jnp.float32))

    return kernel


def _norm3d_kernel(x_ref, scale_ref, bias_ref, o_ref):
    x = x_ref[...].astype(jnp.float32)                    # (tile_n, C, tile_l)
    o_ref[...] = (x * scale_ref[...] + bias_ref[...]).astype(o_ref.dtype)


def _bn_3d_two_pass(x, gamma, beta, tile_n=None, tile_l=None):
    N, C, L = x.shape
    bud = _budgets()
    if tile_l is None:
        tile_l = _auto_tile_l(L)
    if tile_n is None:
        tile_n = _auto_tile_n(N, C, tile_l, x.dtype, bud["tile_target"])
    tile_n = int(min(tile_n, N))
    tile_l = int(min(tile_l, L))

    n_i = pl.cdiv(N, tile_n)
    n_j = pl.cdiv(L, tile_l)
    total = n_i * n_j
    n_shards = 2 if total >= 2 else 1        # split stats read across v7x TCs
    tps = pl.cdiv(total, n_shards)
    need_mask = (N % tile_n != 0) or (L % tile_l != 0) or (total != n_shards * tps)

    def x_map(s, k):
        t = jnp.minimum(s * tps + k, total - 1)
        return (t // n_j, 0, t % n_j)

    # Pass 1: per-shard, per-channel sum / sum-of-squares.
    s_part, q_part = pl.pallas_call(
        _make_stats3d_kernel(N, L, tile_n, tile_l, n_j, tps, need_mask),
        out_shape=(jax.ShapeDtypeStruct((n_shards, C, 1), jnp.float32),
                   jax.ShapeDtypeStruct((n_shards, C, 1), jnp.float32)),
        grid=(n_shards, tps),
        in_specs=[pl.BlockSpec((tile_n, C, tile_l), x_map)],
        out_specs=(pl.BlockSpec((1, C, 1), lambda s, k: (s, 0, 0)),
                   pl.BlockSpec((1, C, 1), lambda s, k: (s, 0, 0))),
        compiler_params=pltpu.CompilerParams(
            dimension_semantics=("parallel", "arbitrary"),
            vmem_limit_bytes=bud["vmem_limit"]),
    )(x)

    count = jnp.float32(N * L)
    ssum = jnp.sum(s_part, axis=0)                         # (C, 1)
    qsum = jnp.sum(q_part, axis=0)
    mean = ssum / count
    var = jnp.maximum(qsum / count - mean * mean, 0.0)
    inv_std = jax.lax.rsqrt(var + _EPS)
    scale_c = gamma.reshape(C, 1).astype(jnp.float32) * inv_std
    bias_c = beta.reshape(C, 1).astype(jnp.float32) - mean * scale_c
    scale = scale_c.reshape(1, C, 1)
    bias = bias_c.reshape(1, C, 1)

    # Pass 2: elementwise normalize; both grid axes independent -> "parallel".
    return pl.pallas_call(
        _norm3d_kernel,
        out_shape=jax.ShapeDtypeStruct((N, C, L), x.dtype),
        grid=(n_i, n_j),
        in_specs=[pl.BlockSpec((tile_n, C, tile_l), lambda i, j: (i, 0, j)),
                  pl.BlockSpec((1, C, 1), lambda i, j: (0, 0, 0)),
                  pl.BlockSpec((1, C, 1), lambda i, j: (0, 0, 0))],
        out_specs=pl.BlockSpec((tile_n, C, tile_l), lambda i, j: (i, 0, j)),
        compiler_params=pltpu.CompilerParams(
            dimension_semantics=("parallel", "parallel"),
            vmem_limit_bytes=bud["vmem_limit"]),
    )(x, scale, bias)


# ---------------------------------------------------------------------------
# Public wrapper: matches nn.BatchNorm1d forward (training-mode statistics).
# ---------------------------------------------------------------------------
def batch_norm_1d(x, gamma, beta):
    """Forward of nn.BatchNorm1d (training mode, batch statistics).

    x: (N, C) or (N, C, L); gamma, beta: (C,).
    """
    bud = _budgets()
    if x.ndim == 2:
        M, C = x.shape
        if _padded_f32_bytes_2d(M, C) <= bud["fused_max"]:
            return _bn_2d_fused(x, gamma, beta, bud)
        return _bn_2d_two_pass(x, gamma, beta)
    elif x.ndim == 3:
        N, C, L = x.shape
        if _padded_f32_bytes_3d(N, C, L) <= bud["fused_max"]:
            return _bn_3d_fused(x, gamma, beta, bud)
        return _bn_3d_two_pass(x, gamma, beta)
    else:
        raise ValueError("BatchNorm1d expects 2D (N,C) or 3D (N,C,L) input")


def _reference(x, gamma, beta):
    axes = (0,) if x.ndim == 2 else (0, 2)
    mean = jnp.mean(x, axis=axes, keepdims=True)
    var = jnp.mean((x - mean) ** 2, axis=axes, keepdims=True)
    g = gamma.reshape((1, -1) + (1,) * (x.ndim - 2))
    b = beta.reshape((1, -1) + (1,) * (x.ndim - 2))
    return (x - mean) * jax.lax.rsqrt(var + _EPS) * g + b


if __name__ == "__main__":
    key = jax.random.PRNGKey(0)
    k1, k2, k3, k4, k5 = jax.random.split(key, 5)

    C = 8
    # nn.BatchNorm1d(num_features) init: weight=1, bias=0.
    gamma1 = jnp.ones((C,), dtype=jnp.float32)
    beta0 = jnp.zeros((C,), dtype=jnp.float32)
    # Non-trivial affine params for the tiled paths.
    g2 = 1.0 + 0.1 * jax.random.normal(k4, (C,), dtype=jnp.float32)
    b2 = 0.1 * jax.random.normal(k5, (C,), dtype=jnp.float32)

    # Case 1: tiny 3-D (N, C, L) -> fused single-block fast path.
    x3 = jax.random.normal(k1, (4, C, 16), dtype=jnp.float32)
    y1 = jax.block_until_ready(batch_norm_1d(x3, gamma1, beta0))
    assert y1.shape == x3.shape and y1.dtype == x3.dtype
    assert jnp.max(jnp.abs(y1 - _reference(x3, gamma1, beta0))) < 1e-4

    # Case 2: 3-D tiled two-pass with N tail (cdiv), L tail mask, 2-shard stats.
    x3b = jax.random.normal(k2, (5, C, 200), dtype=jnp.float32)
    y2 = jax.block_until_ready(_bn_3d_two_pass(x3b, g2, b2, tile_n=2, tile_l=128))
    assert jnp.max(jnp.abs(y2 - _reference(x3b, g2, b2))) < 1e-4

    # Case 3: tiny 2-D (N, C) -> fused fast path.
    x2 = jax.random.normal(k3, (16, C), dtype=jnp.float32)
    y3 = jax.block_until_ready(batch_norm_1d(x2, gamma1, beta0))
    assert jnp.max(jnp.abs(y3 - _reference(x2, gamma1, beta0))) < 1e-4

    # Case 4: 2-D two-pass with automatic lane-dense repack (M divisible).
    x2b = jax.random.normal(k1, (24, C), dtype=jnp.float32)
    y4 = jax.block_until_ready(_bn_2d_two_pass(x2b, g2, b2))
    assert jnp.max(jnp.abs(y4 - _reference(x2b, g2, b2))) < 1e-4

    # Case 5: 2-D two-pass, no repack, partial row tile + clamped duplicate tile.
    x2c = jax.random.normal(k2, (20, C), dtype=jnp.float32)
    y5 = jax.block_until_ready(_bn_2d_two_pass(x2c, g2, b2, tile_m=8, repack=1))
    assert jnp.max(jnp.abs(y5 - _reference(x2c, g2, b2))) < 1e-4

    # Case 6: bf16 3-D input through the dispatcher (fused path, dtype-aware).
    x3c = jax.random.normal(k3, (6, C, 32), dtype=jnp.float32).astype(jnp.bfloat16)
    y6 = jax.block_until_ready(batch_norm_1d(x3c, gamma1, beta0))
    assert y6.dtype == jnp.bfloat16
    ref6 = _reference(x3c.astype(jnp.float32), gamma1, beta0)
    assert jnp.max(jnp.abs(y6.astype(jnp.float32) - ref6)) < 5e-2

    print("KERNEL_OK")
</pallas_src>

<mosaic_0001>
module attributes {stable_mosaic.version = 11 : i64} {
  func.func @_fused3d_kernel(%arg0: memref<4x8x16xf32, #tpu.memory_space<vmem>>, %arg1: memref<1x8x1xf32, #tpu.memory_space<vmem>>, %arg2: memref<1x8x1xf32, #tpu.memory_space<vmem>>, %arg3: memref<4x8x16xf32, #tpu.memory_space<vmem>>) attributes {dimension_semantics = [], scalar_prefetch = 0 : i64, scratch_operands = 0 : i64, tpu.core_type = #tpu.core_type<tc>} {
    %c0 = arith.constant 0 : index
    %c0_0 = arith.constant 0 : index
    %c0_1 = arith.constant 0 : index
    %0 = vector.load %arg0[%c0, %c0_0, %c0_1] : memref<4x8x16xf32, #tpu.memory_space<vmem>>, vector<4x8x16xf32>
    %cst = arith.constant dense<0.000000e+00> : vector<4x8xf32>
    %1 = vector.multi_reduction <add>, %0, %cst [2] : vector<4x8x16xf32> to vector<4x8xf32>
    %2 = vector.shape_cast %1 : vector<4x8xf32> to vector<4x8x1xf32>
    %cst_2 = arith.constant dense<0.000000e+00> : vector<8x1xf32>
    %3 = vector.multi_reduction <add>, %2, %cst_2 [0] : vector<4x8x1xf32> to vector<8x1xf32>
    %4 = vector.shape_cast %3 : vector<8x1xf32> to vector<1x8x1xf32>
    %cst_3 = arith.constant 6.400000e+01 : f32
    %5 = vector.broadcast %cst_3 : f32 to vector<1x8x1xf32>
    %6 = arith.divf %4, %5 : vector<1x8x1xf32>
    %7 = vector.broadcast %6 : vector<1x8x1xf32> to vector<4x8x16xf32>
    %8 = arith.subf %0, %7 : vector<4x8x16xf32>
    %9 = arith.mulf %8, %8 : vector<4x8x16xf32>
    %cst_4 = arith.constant dense<0.000000e+00> : vector<4x8xf32>
    %10 = vector.multi_reduction <add>, %9, %cst_4 [2] : vector<4x8x16xf32> to vector<4x8xf32>
    %11 = vector.shape_cast %10 : vector<4x8xf32> to vector<4x8x1xf32>
    %cst_5 = arith.constant dense<0.000000e+00> : vector<8x1xf32>
    %12 = vector.multi_reduction <add>, %11, %cst_5 [0] : vector<4x8x1xf32> to vector<8x1xf32>
    %13 = vector.shape_cast %12 : vector<8x1xf32> to vector<1x8x1xf32>
    %cst_6 = arith.constant 6.400000e+01 : f32
    %14 = vector.broadcast %cst_6 : f32 to vector<1x8x1xf32>
    %15 = arith.divf %13, %14 : vector<1x8x1xf32>
    %cst_7 = arith.constant 9.99999974E-6 : f32
    %16 = vector.broadcast %cst_7 : f32 to vector<1x8x1xf32>
    %17 = arith.addf %15, %16 : vector<1x8x1xf32>
    %18 = math.rsqrt %17 : vector<1x8x1xf32>
    %19 = vector.broadcast %18 : vector<1x8x1xf32> to vector<4x8x16xf32>
    %20 = arith.mulf %8, %19 : vector<4x8x16xf32>
    %c0_8 = arith.constant 0 : index
    %c0_9 = arith.constant 0 : index
    %c0_10 = arith.constant 0 : index
    %21 = vector.load %arg1[%c0_8, %c0_9, %c0_10] : memref<1x8x1xf32, #tpu.memory_space<vmem>>, vector<1x8x1xf32>
    %22 = vector.broadcast %21 : vector<1x8x1xf32> to vector<4x8x16xf32>
    %23 = arith.mulf %20, %22 : vector<4x8x16xf32>
    %c0_11 = arith.constant 0 : index
    %c0_12 = arith.constant 0 : index
    %c0_13 = arith.constant 0 : index
    %24 = vector.load %arg2[%c0_11, %c0_12, %c0_13] : memref<1x8x1xf32, #tpu.memory_space<vmem>>, vector<1x8x1xf32>
    %25 = vector.broadcast %24 : vector<1x8x1xf32> to vector<4x8x16xf32>
    %26 = arith.addf %23, %25 : vector<4x8x16xf32>
    %c0_14 = arith.constant 0 : index
    %c0_15 = arith.constant 0 : index
    %c0_16 = arith.constant 0 : index
    %27 = vector.load %arg3[%c0_14, %c0_15, %c0_16] : memref<4x8x16xf32, #tpu.memory_space<vmem>>, vector<4x8x16xf32>
    tpu.vector_store %arg3[%c0_14, %c0_15, %c0_16], %26 {strides = array<i32>} : memref<4x8x16xf32, #tpu.memory_space<vmem>>, vector<4x8x16xf32>,
    return
  }
}

</mosaic_0001>

<bundles_post_ra>
// kernel: tpu_custom_call.1
= control target key start
LH: loop header
LB: loop body
LE: loop exit
PB: predicated region body
PF: predicated region fallthrough
CT: control target
= control target key end

     0   :  { %8 = vsyncpa [#allocation3], 0  ;;  %s230_s0 = inlined_call_operand.hbm [shape: f32[4,8,16], index: 0, kind: input, shape index: {}]   ;;  %s231_s1 = inlined_call_operand.vmem [shape: f32[1,8,1], index: 1, kind: input, shape index: {}]   ;;  %s232_s2 = inlined_call_operand.vmem [shape: f32[1,8,1], index: 2, kind: input, shape index: {}]   ;;  %s233_s3 = inlined_call_operand.hbm [shape: f32[4,8,16], index: 3, kind: output, shape index: {}]  }
   0x1   :  { %9 = vsyncpa [#allocation4], 0  ;;  %s175_s12 = smov [#allocation2]  }
   0x2   :  { %s15_s13 = sshll.u32 %s175_s12, 4  ;;  %s16_s13 = int_to_ptr.vmem [resolvable:$true] %s15_s13 }
   0x3   :  { %s139_s14 = scalar_lea.vmem %s16_s13, 512  ;;  %p144_p1 = scmp.lt.s32.totalorder %s16_s13, %s16_s13 }
   0x4   :  { %p140_p0 = scmp.ne.s32.totalorder %s16_s13, %s139_s14  ;;  %p145_p2 = scmp.lt.s32.totalorder %s139_s14, %s139_s14 }
   0x6   :  { %p146_p3 = por %p145_p2, %p144_p1 }
   0x8   :  { %p147_p4 = pnand %p146_p3, %p140_p0 }
   0xa   :  { %150 = shalt.err (!%p147_p4)
}
   0xb   :  { %s176_s15 = smov 128   ;;  %s177_s16 = smov 8  }
   0xc   :  { %21 = dma.hbm_to_vmem [thread:$0]  %s230_s0, 512, %s16_s13, [#allocation3], %s176_s15, %s176_s15, %s177_s16  }
   0xd   :  { %171 = dma.done.wait [#allocation3], 512  }
   0xe   :  { %172 = vsyncadd [#allocation3], 4294966784  ;;  %vm33_vm0 = vcmask 130048   ;;  %v29_v0 = vld [vmem:[#allocation2] sm:$0xff]  ;;  %v31_v1 = vld [vmem:[#allocation2 + $0x10] sm:$0xff]  ;;  %v178_v8 = vmov 0  }
   0xf   :  { %v30_v2 = vld [vmem:[#allocation2 + $0x8] sm:$0xff]  ;;  %v34_v3 = vsel %vm33_vm0, %v29_v0, 0.0  ;;  %v40_v4 = vsel %vm33_vm0, %v31_v1, 0.0  ;;  %v32_v5 = vld [vmem:[#allocation2 + $0x18] sm:$0xff]  ;;  %127 = vset.pattern.permute.xlu0 %v178_v8  ;;  %128 = vset.pattern.permute.xlu1 %v178_v8  ;;  %v91_v29 = vld [vmem:[%s232_s2] sm:$0xff]  ;;  %s179_s2 = smov [#allocation5]  }
  0x10   :  { %35 = vadd.xlane.f32.xlu0 %v34_v3  ;;  %41 = vadd.xlane.f32.xlu1 %v40_v4  ;;  %v37_v6 = vsel %vm33_vm0, %v30_v2, 0.0  ;;  %v43_v7 = vsel %vm33_vm0, %v32_v5, 0.0  ;;  %v81_v30 = vld [vmem:[%s231_s1] sm:$0xff]  ;;  %s110_s1 = sshll.u32 %s179_s2, 4  ;;  %s111_s1 = int_to_ptr.vmem [resolvable:$true] %s110_s1 }
  0x11   :  { %s151_s22 = scalar_lea.vmem %s111_s1, 512  ;;  %p156_p6 = scmp.lt.s32.totalorder %s111_s1, %s111_s1 }
  0x12   :  { %p152_p5 = scmp.ne.s32.totalorder %s111_s1, %s151_s22  ;;  %p157_p7 = scmp.lt.s32.totalorder %s151_s22, %s151_s22 }
  0x14   :  { %38 = vadd.xlane.f32.xlu0 %v37_v6  ;;  %44 = vadd.xlane.f32.xlu1 %v43_v7  ;;  %p158_p8 = por %p157_p7, %p156_p6 }
  0x16   :  { %p159_p9 = pnand %p158_p8, %p152_p5 }
  0x99   :  { %v36_v9 = vpop.xlane.xlu0 %35  ;;  %v42_v10 = vpop.xlane.xlu1 %41 }
  0x9d   :  { %v39_v11 = vpop.xlane.xlu0 %38  ;;  %v45_v13 = vpop.xlane.xlu1 %44 }
  0x9e   :  { %v46_v12 = vadd.f32 %v39_v11, %v36_v9 }
  0xa0   :  { %v47_v14 = vadd.f32 %v46_v12, %v42_v10 }
  0xa2   :  { %v48_v15 = vadd.f32 %v47_v14, %v45_v13 }
  0xa4   :  { %v50_v16 = vmul.f32 0.015625, %v48_v15 }
  0xa6   :  { %v52_v17 = vsub.f32 %v30_v2, %v50_v16  ;;  %v51_v18 = vsub.f32 %v29_v0, %v50_v16  ;;  %v54_v19 = vsub.f32 %v32_v5, %v50_v16  ;;  %v53_v20 = vsub.f32 %v31_v1, %v50_v16 }
  0xa8   :  { %v56_v21 = vmul.f32 %v52_v17, %v52_v17  ;;  %v55_v22 = vmul.f32 %v51_v18, %v51_v18  ;;  %v58_v25 = vmul.f32 %v54_v19, %v54_v19  ;;  %v57_v26 = vmul.f32 %v53_v20, %v53_v20 }
  0xaa   :  { %v62_v23 = vsel %vm33_vm0, %v56_v21, 0.0  ;;  %v59_v24 = vsel %vm33_vm0, %v55_v22, 0.0  ;;  %v68_v27 = vsel %vm33_vm0, %v58_v25, 0.0  ;;  %v65_v28 = vsel %vm33_vm0, %v57_v26, 0.0 }
  0xab   :  { %63 = vadd.xlane.f32.xlu1 %v62_v23  ;;  %60 = vadd.xlane.f32.xlu0 %v59_v24 }
  0xaf   :  { %69 = vadd.xlane.f32.xlu1 %v68_v27  ;;  %66 = vadd.xlane.f32.xlu0 %v65_v28 }
  0xc0   :  { %94 = vperm.xlu1 %128, %v91_v29  }
  0xc5   :  { %84 = vperm.xlu0 %127, %v81_v30  }
 0x134   :  { %v64_v31 = vpop.xlane.xlu1 %63  ;;  %v61_v32 = vpop.xlane.xlu0 %60 }
 0x135   :  { %v71_v33 = vadd.f32 %v64_v31, %v61_v32 }
 0x138   :  { %v67_v34 = vpop.xlane.xlu0 %66  ;;  %v70_v36 = vpop.xlane.xlu1 %69 }
 0x139   :  { %v72_v35 = vadd.f32 %v71_v33, %v67_v34 }
 0x13b   :  { %v73_v37 = vadd.f32 %v72_v35, %v70_v36 }
 0x13c   :  { %v95_v46 = vpop.permute.xlu1 %94 }
 0x13d   :  { %v74_v38 = vmul.f32 0.015625, %v73_v37 }
 0x13f   :  { %v75_v39 = vadd.f32 1e-05, %v74_v38 }
 0x140   :  { %v85_v41 = vpop.permute.xlu0 %84 }
 0x141   :  { %129 = vrsqrt.f32 %v75_v39 }
 0x14e   :  { %v130_v40 = vpop.eup %129 }
 0x14f   :  { %v77_v42 = vmul.f32 %v130_v40, %v51_v18  ;;  %v78_v43 = vmul.f32 %v130_v40, %v52_v17  ;;  %v79_v44 = vmul.f32 %v130_v40, %v53_v20  ;;  %v80_v45 = vmul.f32 %v130_v40, %v54_v19 }
 0x151   :  { %v87_v47 = vmul.f32 %v85_v41, %v77_v42  ;;  %v88_v48 = vmul.f32 %v85_v41, %v78_v43  ;;  %v89_v49 = vmul.f32 %v85_v41, %v79_v44  ;;  %v90_v50 = vmul.f32 %v85_v41, %v80_v45 }
 0x153   :  { %v97_v51 = vadd.f32 %v95_v46, %v87_v47  ;;  %v98_v52 = vadd.f32 %v95_v46, %v88_v48  ;;  %v99_v53 = vadd.f32 %v95_v46, %v89_v49  ;;  %v100_v54 = vadd.f32 %v95_v46, %v90_v50 }
 0x155   :  { %101 = vst.msk [vmem:[#allocation5] sm:$0xff] %vm33_vm0, %v97_v51  ;;  %102 = vst.msk [vmem:[#allocation5 + $0x8] sm:$0xff] %vm33_vm0, %v98_v52 }
 0x156   :  { %103 = vst.msk [vmem:[#allocation5 + $0x10] sm:$0xff] %vm33_vm0, %v99_v53  ;;  %104 = vst.msk [vmem:[#allocation5 + $0x18] sm:$0xff] %vm33_vm0, %v100_v54 }
 0x157   :  { %162 = shalt.err (!%p159_p9)
}
 0x158   :  { %116 = dma.vmem_to_hbm [thread:$0]  %s111_s1, 512, %s233_s3, [#allocation4], %s176_s15, %s176_s15, %s177_s16  }
 0x159   :  { %173 = dma.done.wait [#allocation4], 512  }
 0x15a   :  { %174 = vsyncadd [#allocation4], 4294966784 }
 0x15b   :  { %120 = vsyncpa [#allocation3], 1 }
 0x15c   :  { %121 = vsyncpa [#allocation4], 1 }

</bundles_post_ra>
